<compile_context>
chip_gen: v7x
topology: tpu7x:2x2x1
jax: 0.10.0
libtpu: 0.0.40
codegen_flags: <defaults>
</compile_context>

<pallas_src>
import math

import jax
import jax.numpy as jnp
from jax.experimental import pallas as pl
from jax.experimental.pallas import tpu as pltpu


# -----------------------------------------------------------------------------
# Sinusoidal PE table (buffer setup, plain JAX - mirrors the torch buffer).
# -----------------------------------------------------------------------------
def make_pe_table(d_model: int, max_len: int = 5000) -> jnp.ndarray:
    position = jnp.arange(0, max_len, dtype=jnp.float32)[:, None]            # [L, 1]
    div_term = jnp.exp(
        jnp.arange(0, d_model, 2, dtype=jnp.float32)
        * (-(math.log(10000.0) / d_model))
    )                                                                        # [D/2]
    ang = position * div_term                                                # [L, D/2]
    pe = jnp.zeros((max_len, d_model), dtype=jnp.float32)
    pe = pe.at[:, 0::2].set(jnp.sin(ang))
    pe = pe.at[:, 1::2].set(jnp.cos(ang))
    return pe                                                                # [L, D]


# -----------------------------------------------------------------------------
# Kernels (pure HBM-bandwidth elementwise work).
# -----------------------------------------------------------------------------
def _pe_add_kernel(x_ref, pe_ref, o_ref):
    # x_ref, pe_ref, o_ref: (TILE_ROWS, COLS); batch dim squeezed away.
    o_ref[...] = x_ref[...] + pe_ref[...]


def _pe_concat_split_kernel(x_ref, pe_ref, o_ref):
    # Used only when D % 128 == 0: both half stores are lane-aligned, unmasked.
    d = x_ref.shape[-1]
    o_ref[:, :d] = x_ref[...]
    o_ref[:, d:] = pe_ref[...]


def _pe_concat_fused_kernel(x_ref, pe_ref, o_ref):
    # D % 128 != 0: build the (tile, 2D) slab in vregs and issue a single
    # full-block store instead of two masked half-width stores.
    o_ref[...] = jnp.concatenate([x_ref[...], pe_ref[...]], axis=-1)


# -----------------------------------------------------------------------------
# Tiling helpers
# -----------------------------------------------------------------------------
# ~4 MiB widest block: add path = 3 blocks x 2 buffers x 4 MiB = 24 MiB, which
# fits the computed vmem limit on every generation (v7x scoped budget included)
# and keeps the ~0.35 us per-step overhead small even at v7x HBM bandwidth.
_TARGET_BLOCK_BYTES = 4 * 1024 * 1024
# Below this total input size, plain XLA is faster (and fuses with neighbours).
_MIN_PALLAS_BYTES = 256 * 1024


def _sublane_multiple(itemsize: int) -> int:
    # 8 rows/sublane-group for f32, 16 for bf16, 32 for int8/fp8.
    return max(8, 32 // max(int(itemsize), 1))


def _tile_rows(total_rows: int, bytes_per_row: int, itemsize: int) -> int:
    """Rows per block: multiple of the dtype sublane multiple, ~4 MiB, capped."""
    mult = _sublane_multiple(itemsize)
    rows = int(_TARGET_BLOCK_BYTES // max(int(bytes_per_row), 1))
    rows = max(mult, (rows // mult) * mult)
    return total_rows if rows >= total_rows else rows


def _compiler_params(per_step_block_bytes) -> pltpu.CompilerParams:
    # vmem limit derived from the actual double-buffered working set (+ headroom)
    # instead of a hard-coded constant; capped to stay inside v7x's scoped budget.
    need = 2 * sum(int(b) for b in per_step_block_bytes)
    limit = min(max(need + (2 << 20), 16 << 20), 48 << 20)
    return pltpu.CompilerParams(
        dimension_semantics=("parallel", "parallel"),
        vmem_limit_bytes=int(limit),
    )


# -----------------------------------------------------------------------------
# pallas_call wrappers
# -----------------------------------------------------------------------------
def _add_call(xs3: jnp.ndarray, pe2: jnp.ndarray, tile: int) -> jnp.ndarray:
    """xs3: (B, R, C); pe2: (rows >= needed, C). out: (B, R, C)."""
    B, R, C = xs3.shape
    itemsize = jnp.dtype(xs3.dtype).itemsize
    blk = tile * C * itemsize
    # Batch innermost: the PE block index (r, 0) repeats across consecutive
    # grid steps, so its DMA is skipped -> PE read once per row tile, not B x.
    grid = (pl.cdiv(R, tile), B)
    return pl.pallas_call(
        _pe_add_kernel,
        out_shape=jax.ShapeDtypeStruct((B, R, C), xs3.dtype),
        grid_spec=pltpu.PrefetchScalarGridSpec(
            num_scalar_prefetch=0,
            grid=grid,
            in_specs=[
                pl.BlockSpec((pl.Squeezed(), tile, C), lambda r, b: (b, r, 0)),
                pl.BlockSpec((tile, C), lambda r, b: (r, 0)),
            ],
            out_specs=pl.BlockSpec((pl.Squeezed(), tile, C),
                                   lambda r, b: (b, r, 0)),
        ),
        compiler_params=_compiler_params([blk, blk, blk]),
    )(xs3, pe2)


def _concat_call(xs: jnp.ndarray, pe: jnp.ndarray, tile: int) -> jnp.ndarray:
    B, T, D = xs.shape
    itemsize = jnp.dtype(xs.dtype).itemsize
    in_blk = tile * D * itemsize
    out_blk = 2 * in_blk
    kernel = _pe_concat_split_kernel if D % 128 == 0 else _pe_concat_fused_kernel
    grid = (pl.cdiv(T, tile), B)
    return pl.pallas_call(
        kernel,
        out_shape=jax.ShapeDtypeStruct((B, T, 2 * D), xs.dtype),
        grid_spec=pltpu.PrefetchScalarGridSpec(
            num_scalar_prefetch=0,
            grid=grid,
            in_specs=[
                pl.BlockSpec((pl.Squeezed(), tile, D), lambda r, b: (b, r, 0)),
                pl.BlockSpec((tile, D), lambda r, b: (r, 0)),
            ],
            out_specs=pl.BlockSpec((pl.Squeezed(), tile, 2 * D),
                                   lambda r, b: (b, r, 0)),
        ),
        compiler_params=_compiler_params([in_blk, in_blk, out_blk]),
    )(xs, pe)


# -----------------------------------------------------------------------------
# Plain-JAX reference (also used as the tiny-shape fallback path).
# -----------------------------------------------------------------------------
def positional_encoding_ref(xs, pe_table, pe_type="add"):
    T = xs.shape[1]
    pe = pe_table[None, :T].astype(xs.dtype)                                 # [1, T, D]
    if pe_type == "add":
        return xs + pe
    if pe_type == "concat":
        return jnp.concatenate(
            [xs, jnp.broadcast_to(pe, (xs.shape[0],) + pe.shape[1:])], axis=-1
        )
    raise NotImplementedError(pe_type)


# -----------------------------------------------------------------------------
# Public wrapper (module.forward equivalent, eval mode)
# -----------------------------------------------------------------------------
def positional_encoding(xs: jnp.ndarray, pe_table: jnp.ndarray,
                        pe_type: str = "add", *,
                        min_pallas_bytes: int = _MIN_PALLAS_BYTES) -> jnp.ndarray:
    """xs: [B, T, D]; pe_table: [max_len, D]."""
    B, T, D = xs.shape
    # Same-dtype astype is a no-op; only pays if the model runs e.g. bf16.
    pe_table = pe_table.astype(xs.dtype)
    itemsize = jnp.dtype(xs.dtype).itemsize
    mult = _sublane_multiple(itemsize)

    # Tiny problems: fixed pallas_call + per-step cost dominates, and a custom
    # call blocks XLA from fusing this elementwise op with its neighbours.
    if B * T * D * itemsize < min_pallas_bytes:
        return positional_encoding_ref(xs, pe_table, pe_type)

    if pe_type == "add":
        L = T * D
        if D < 128 and L % 128 == 0:
            # Lane-dense path for small d_model: view the (T, D) plane of each
            # batch element as (R, C) with C a multiple of 128 so stores are
            # full-width (unmasked) vst.  The PE slice/reshape is a tiny one-off
            # copy (T*D elements) compared with the B*T*D streamed by the kernel.
            C = max(c for c in (2048, 1024, 512, 256, 128) if L % c == 0)
            R = L // C
            xs3 = xs.reshape(B, R, C)
            pe2 = pe_table[:T].reshape(R, C)
            tile = _tile_rows(R, C * itemsize, itemsize)
            out = _add_call(xs3, pe2, tile)
            return out.reshape(B, T, D)

        # D already lane-friendly: tile the time axis and let the BlockSpec
        # index straight into the full PE table (no wrapper-side slice copy).
        tile = _tile_rows(T, D * itemsize, itemsize)
        # If the tile is T itself and not sublane aligned, fall back to a sliced
        # table so the PE block equals the full array dims (layout rule).
        pe_arg = pe_table if tile % mult == 0 else pe_table[:T]
        return _add_call(xs, pe_arg, tile)

    if pe_type == "concat":
        tile = _tile_rows(T, 2 * D * itemsize, itemsize)   # budget on the widest (output) block
        pe_arg = pe_table if tile % mult == 0 else pe_table[:T]
        return _concat_call(xs, pe_arg, tile)

    raise NotImplementedError(pe_type)


# -----------------------------------------------------------------------------
# Tests
# -----------------------------------------------------------------------------
if __name__ == "__main__":
    key = jax.random.PRNGKey(0)
    ks = jax.random.split(key, 6)

    def check(k, B, T, D, pe_type, *, force_pallas, atol=1e-6):
        xs = jax.random.normal(k, (B, T, D), dtype=jnp.float32)
        pe_table = make_pe_table(D, max_len=5000)
        out = positional_encoding(
            xs, pe_table, pe_type=pe_type,
            min_pallas_bytes=0 if force_pallas else _MIN_PALLAS_BYTES)
        jax.block_until_ready(out)
        ref = positional_encoding_ref(xs, pe_table, pe_type=pe_type)
        assert out.shape == ref.shape, (pe_type, out.shape, ref.shape)
        assert jnp.allclose(out, ref, atol=atol), (pe_type, B, T, D)
        return out

    # Primary small shapes (batch=2, seq=8, d_model=32) through the Pallas path:
    # exercises the lane-dense flattened 'add' path and the fused 'concat' kernel.
    check(ks[0], 2, 8, 32, "add", force_pallas=True)
    check(ks[1], 2, 8, 32, "concat", force_pallas=True)

    # Same small shape through the tiny-problem plain-XLA fallback.
    check(ks[0], 2, 8, 32, "add", force_pallas=False)

    # Wide-D 'add' path (full PE table indexed by the BlockSpec), with a
    # partial last row tile (T=5000 > 4096-row tile) and B innermost.
    check(ks[2], 2, 5000, 256, "add", force_pallas=False)

    # Small-D flattened 'add' path at a size above the fallback threshold.
    check(ks[3], 4, 512, 64, "add", force_pallas=False)

    # Concat, D % 128 != 0 -> fused single-store kernel (2*D = 128, lane-dense).
    check(ks[4], 4, 512, 64, "concat", force_pallas=False)

    # Concat, D % 128 == 0 -> split lane-aligned store kernel.
    check(ks[5], 4, 256, 128, "concat", force_pallas=False)

    print("KERNEL_OK")
</pallas_src>

<mosaic_0001>
module attributes {stable_mosaic.version = 11 : i64} {
  func.func @_pe_add_kernel(%arg0: i32, %arg1: i32, %arg2: memref<1x1x256xf32, #tpu.memory_space<vmem>>, %arg3: memref<1x256xf32, #tpu.memory_space<vmem>>, %arg4: memref<1x1x256xf32, #tpu.memory_space<vmem>>) attributes {dimension_semantics = [#tpu.dimension_semantics<parallel>, #tpu.dimension_semantics<parallel>], iteration_bounds = array<i64: 1, 2>, scalar_prefetch = 0 : i64, scratch_operands = 0 : i64, tpu.core_type = #tpu.core_type<tc>, window_params = [{transform_indices = @transform_0, window_bounds = array<i64: 1, 1, 256>}, {transform_indices = @transform_1, window_bounds = array<i64: 1, 256>}, {transform_indices = @transform_2, window_bounds = array<i64: 1, 1, 256>}]} {
    %c0 = arith.constant 0 : index
    %c0_0 = arith.constant 0 : index
    %c0_1 = arith.constant 0 : index
    %0 = vector.load %arg2[%c0, %c0_0, %c0_1] : memref<1x1x256xf32, #tpu.memory_space<vmem>>, vector<1x1x256xf32>
    %1 = vector.shape_cast %0 : vector<1x1x256xf32> to vector<1x256xf32>
    %c0_2 = arith.constant 0 : index
    %c0_3 = arith.constant 0 : index
    %2 = vector.load %arg3[%c0_2, %c0_3] : memref<1x256xf32, #tpu.memory_space<vmem>>, vector<1x256xf32>
    %3 = arith.addf %1, %2 : vector<1x256xf32>
    %c0_4 = arith.constant 0 : index
    %c0_5 = arith.constant 0 : index
    %c0_6 = arith.constant 0 : index
    %4 = vector.load %arg4[%c0_4, %c0_5, %c0_6] : memref<1x1x256xf32, #tpu.memory_space<vmem>>, vector<1x1x256xf32>
    %5 = vector.shape_cast %4 : vector<1x1x256xf32> to vector<1x256xf32>
    %6 = vector.shape_cast %3 : vector<1x256xf32> to vector<1x1x256xf32>
    tpu.vector_store %arg4[%c0_4, %c0_5, %c0_6], %6 {strides = array<i32>} : memref<1x1x256xf32, #tpu.memory_space<vmem>>, vector<1x1x256xf32>,
    return
  }
  func.func @transform_0(%arg0: i32, %arg1: i32) -> (i32, i32, i32) {
    %c0_i32 = arith.constant 0 : i32
    %c0_i32_0 = arith.constant 0 : i32
    return %arg1, %arg0, %c0_i32 : i32, i32, i32
  }
  func.func @transform_1(%arg0: i32, %arg1: i32) -> (i32, i32) {
    %c0_i32 = arith.constant 0 : i32
    %c0_i32_0 = arith.constant 0 : i32
    return %arg0, %c0_i32 : i32, i32
  }
  func.func @transform_2(%arg0: i32, %arg1: i32) -> (i32, i32, i32) {
    %c0_i32 = arith.constant 0 : i32
    %c0_i32_0 = arith.constant 0 : i32
    return %arg1, %arg0, %c0_i32 : i32, i32, i32
  }
}

</mosaic_0001>

<bundles_post_ra>
// kernel: tpu_custom_call.1
= control target key start
LH: loop header
LB: loop body
LE: loop exit
PB: predicated region body
PF: predicated region fallthrough
CT: control target
= control target key end

     0   :  { %7 = vsyncpa [#allocation3], 0  ;;  %s705_s0 = inlined_call_operand.hbm [shape: f32[2,1,256], index: 0, kind: input, shape index: {}]   ;;  %s706_s1 = inlined_call_operand.vmem [shape: f32[1,256], index: 1, kind: input, shape index: {}]   ;;  %s707_s2 = inlined_call_operand.hbm [shape: f32[2,1,256], index: 2, kind: output, shape index: {}]  }
   0x1   :  { %9 = vsyncpa [#allocation3 + $0x1], 0 }
   0x2   :  { %10 = vsyncpa [#allocation4], 0 }
   0x3   :  { %12 = vsyncpa [#allocation4 + $0x1], 0  ;;  %s530_s9 = smov 0   ;;  %s532_s10 = smov 0  }
   0x4   :  { %s534_s11 = smov 0   ;;  %s536_s12 = smov 0  }
   0x5   :  { %s538_s13 = smov 0   ;;  %s540_s14 = smov 0  }
   0x6 LB: > { %s319_s15 = sadd.s32 4294967295, %s511_s14   ;;  %s320_s16 = sadd.s32 4294967294, %s511_s14   ;;  %s511_s14 = sphi %s540_s14, %s18_s14   ;;  %s507_s13 = sphi %s538_s13, %s723_s13   ;;  %s503_s12 = sphi %s536_s12, %s722_s12   ;;  %s499_s11 = sphi %s534_s11, %s721_s11   ;;  %s495_s10 = sphi %s532_s10, %s720_s10   ;;  %s491_s9 = sphi %s530_s9, %s719_s9  }
   0x7   : > { %s27_s17 = sadd.s32 1, %s507_s13  ;;  %s39_s18 = sadd.s32 1, %s499_s11 }
   0x8   : > { %p28_p0 = scmp.ge.s32.totalorder %s27_s17, 2  ;;  %p46_p1 = scmp.ne.s32.totalorder %s499_s11, %s495_s10 }
   0x9   : > { %p47_p2 = scmp.eq.s32.totalorder %s511_s14, 0  ;;  %p52_p3 = scmp.ne.s32.totalorder %s495_s10, %s491_s9 }
   0xa   : > { %s725_s17 = smov (%p28_p0, %s27_s17), 0  ;;  %p53_p5 = scmp.eq.s32.totalorder %s319_s15, 0 }
   0xb   : > { %p571_p4 = por %p47_p2, %p46_p1  ;;  %s34_s20 = ssub.s32 %s507_s13, %s725_s17 }
   0xc   : > { %p104_p6 = scmp.eq.s32.totalorder %s319_s15, 1  ;;  %p37_p7 = scmp.eq.s32.totalorder %s34_s20, 0 }
   0xd   : > { %p577_p8 = por %p53_p5, %p52_p3  ;;  %p110_p10 = scmp.eq.s32.totalorder %s320_s16, 1 }
   0xe   : > { %p581_p9 = por %p104_p6, %p46_p1  ;;  %p349_p13 = scmp.lt.s32.totalorder %s511_s14, 2 }
   0xf   : > { %s586_s23 = scalar_select %p37_p7, %s499_s11, %s39_s18  }
  0x10   : > { %s711_s22 = scalar_select %p581_p9, 1, 0 }
  0x11   : > { %p588_p11 = por %p110_p10, %p52_p3  ;;  %s137_s25 = sand.u32 1, %s499_s11  }
  0x12   : > { %s324_s26 = sshll.u32 %s137_s25, 1  ;;  %s335_s27 = sshll.u32 %s507_s13, 5 }
  0x13   : > { %s712_s24 = scalar_select %p588_p11, 1, 0 }
  0x14   : > { %s599_s30 = scalar_lea.hbm %s705_s0, %s335_s27  ;;  %s141_s3 = scalar_lea.vmem [#allocation2], %s324_s26 }
  0x15   : > { %s151_s4 = sshll.u32 %s141_s3, 4  ;;  %p605_p0 = pnand %p349_p13, %p571_p4  ;;  %s601_s4 = int_to_ptr.vmem [resolvable:$true] %s151_s4 }
  0x16   : > { %s138_s6 = scalar_lea.sflag [#allocation3], %s137_s25  ;;  %s399_s7 = scalar_lea.hbm %s599_s30, 32 }
  0x17   : > { %p400_p3 = scmp.ne.s32.totalorder %s599_s30, %s399_s7  ;;  %p401_p5 = pneg %p605_p0 }
  0x18   : > { %s404_s16 = scalar_lea.hbm %s705_s0, 64  ;;  %p405_p4 = scmp.lt.u32.totalorder %s599_s30, %s705_s0 }
  0x19   : > { %p402_p6 = pnand %p401_p5, %p400_p3  ;;  %p406_p10 = scmp.lt.u32.totalorder %s404_s16, %s399_s7 }
  0x1a   : > { %p408_p12 = scmp.lt.u32.totalorder %s399_s7, %s599_s30 }
  0x1b   : > { %p403_p7 = pneg %p402_p6  ;;  %p407_p13 = por %p406_p10, %p405_p4 }
  0x1d   : > { %p409_p1 = por %p408_p12, %p407_p13 }
  0x1f   : > { %p410_p2 = pnand %p409_p1, %p403_p7 }
  0x21   : > { %413 = shalt.err (!%p410_p2)
}
  0x22   : > { %s414_s20 = scalar_lea.vmem %s601_s4, 32  ;;  %s513_s25 = smov [#allocation2]  }
  0x23   : > { %p415_p3 = scmp.ne.s32.totalorder %s601_s4, %s414_s20  ;;  %s419_s26 = sshll.u32 %s513_s25, 4  ;;  %s420_s26 = int_to_ptr.vmem [resolvable:$false] %s419_s26 }
  0x24   : > { %s421_s27 = scalar_lea.vmem %s420_s26, 64  ;;  %p422_p9 = scmp.lt.s32.totalorder %s601_s4, %s420_s26 }
  0x25   : > { %p417_p6 = pnand %p415_p3, %p401_p5  ;;  %p423_p4 = scmp.lt.s32.totalorder %s421_s27, %s414_s20 }
  0x27   : > { %p418_p11 = pneg %p417_p6  ;;  %p424_p10 = por %p423_p4, %p422_p9 }
  0x29   : > { %p425_p12 = pnand %p424_p10, %p418_p11 }
  0x2b   : > { %428 = shalt.err (!%p425_p12)
}
  0x2c   : > { %344 = dma.hbm_to_vmem [thread:$0]  (!%p605_p0), %s599_s30, 32, %s601_s4, %s138_s6  }
  0x2d   : > { %p714_p1 = scmp.lt.s32.totalorder %s511_s14, 3  ;;  %p715_p2 = scmp.ge.s32.totalorder %s511_s14, 1 }
  0x2f   : > { %p157_p5 = pnand %p715_p2, %p714_p1 }
  0x30   : > { %s641_s28 = sand.u32 (!%p157_p5), 1, %s495_s10  }
  0x31   : > { %160 = sbr.rel (%p157_p5) target bundleno = 83 (0x53), region = 28  ;;  %s328_s29 = sshll.u32 (!%p157_p5), %s641_s28, 1 }
  0x32   : > { %s163_s3 = scalar_lea.sflag (!%p157_p5), [#allocation3], %s641_s28  ;;  %s166_s7 = scalar_lea.vmem (!%p157_p5), [#allocation2], %s328_s29 }
  0x38   : > { %482 = dma.done.wait (%p577_p8), %s163_s3, 32  }
  0x39   : > { %484 = vsyncadd (%p577_p8), %s163_s3, 4294967264  ;;  %v198_v0 = vlaneseq  ;;  %s190_s30 = scalar_lea.vmem [#allocation5], %s328_s29  ;;  %s336_s5 = sshll.u32 %s503_s12, 5  ;;  %v195_v1 = vld [vmem:[%s166_s7] sm:$0x3] }
  0x3a   : > { %s220_s4 = sshll.u32 %s190_s30, 4  ;;  %v196_v2 = vld [vmem:[%s706_s1] sm:$0x3]  ;;  %s658_s21 = scalar_lea.hbm %s707_s2, %s336_s5  ;;  %s653_s4 = int_to_ptr.vmem [resolvable:$true] %s220_s4 }
  0x3b   : > { %vm200_vm0 = vcmp.lt.s32.totalorder %v198_v0, 256  ;;  %v197_v3 = vadd.f32 %v196_v2, %v195_v1  ;;  %s204_s18 = scalar_lea.sflag [#allocation4], %s641_s28  ;;  %s429_s12 = scalar_lea.vmem %s653_s4, 32 }
  0x3c   : > { %p430_p8 = scmp.ne.s32.totalorder %s653_s4, %s429_s12  ;;  %p716_p9 = scmp.ne.s32.totalorder %s711_s22, 0 }
  0x3d   : > { %202 = vst.msk [vmem:[%s190_s30] sm:$0x3] %vm200_vm0, %v197_v3  ;;  %s514_s19 = smov [#allocation5]  }
  0x3e   : > { %p431_p11 = pnand %p430_p8, %p716_p9  ;;  %s433_s20 = sshll.u32 %s514_s19, 4  ;;  %s434_s20 = int_to_ptr.vmem [resolvable:$false] %s433_s20 }
  0x3f   : > { %s435_s25 = scalar_lea.vmem %s434_s20, 64  ;;  %p436_p7 = scmp.lt.s32.totalorder %s653_s4, %s434_s20 }
  0x40   : > { %p432_p0 = pneg %p431_p11  ;;  %p437_p13 = scmp.lt.s32.totalorder %s435_s25, %s429_s12 }
  0x42   : > { %p438_p3 = por %p437_p13, %p436_p7 }
  0x44   : > { %p439_p6 = pnand %p438_p3, %p432_p0 }
  0x46   : > { %442 = shalt.err (!%p439_p6)
}
  0x47   : > { %s443_s26 = scalar_lea.hbm %s658_s21, 32  ;;  %s447_s29 = scalar_lea.hbm %s707_s2, 64 }
  0x48   : > { %p444_p4 = scmp.ne.s32.totalorder %s658_s21, %s443_s26  ;;  %p448_p1 = scmp.lt.u32.totalorder %s658_s21, %s707_s2 }
  0x49   : > { %p449_p2 = scmp.lt.u32.totalorder %s447_s29, %s443_s26  ;;  %p451_p8 = scmp.lt.u32.totalorder %s443_s26, %s658_s21 }
  0x4a   : > { %p445_p10 = pnand %p444_p4, %p716_p9 }
  0x4b   : > { %p450_p5 = por %p449_p2, %p448_p1 }
  0x4c   : > { %p446_p12 = pneg %p445_p10 }
  0x4d   : > { %p452_p11 = por %p451_p8, %p450_p5 }
  0x4f   : > { %p453_p0 = pnand %p452_p11, %p446_p12 }
  0x51   : > { %456 = shalt.err (!%p453_p0)
}
  0x52   : > { %339 = dma.vmem_to_hbm [thread:$0]  (%p716_p9), %s653_s4, 32, %s658_s21, %s204_s18  }
  0x53 PF: > { %s232_s30 = sand.u32 1, %s491_s9   ;;  %p717_p7 = scmp.ne.s32.totalorder %s712_s24, 0 }
  0x54   : > { %p718_p13 = scmp.ge.s32.totalorder %s511_s14, 2  ;;  %s233_s5 = scalar_lea.sflag [#allocation4], %s232_s30 }
  0x56   : > { %p346_p3 = pnand %p718_p13, %p717_p7 }
  0x58   : > { %486 = dma.done.wait (!%p346_p3), %s233_s5, 32  }
  0x59   : > { %488 = vsyncadd (!%p346_p3), %s233_s5, 4294967264  ;;  %s18_s14 = sadd.s32 1, %s511_s14   ;;  %s719_s9 = smov %s495_s10 }
  0x5a   : > { %p15_p6 = scmp.ge.s32.totalorder %s18_s14, 4   ;;  %s720_s10 = smov %s499_s11 }
  0x5b   : > { %s721_s11 = smov %s586_s23  ;;  %s722_s12 = smov %s507_s13 }
  0x5c   : > { %s723_s13 = smov %s725_s17  ;;  %17 = sbr.rel (!%p15_p6) target bundleno = 6 (0x6), region = 76 }
  0x63   :  { %238 = vsyncpa [#allocation3], 1 }
  0x64   :  { %240 = vsyncpa [#allocation3 + $0x1], 1 }
  0x65   :  { %241 = vsyncpa [#allocation4], 1 }
  0x66   :  { %243 = vsyncpa [#allocation4 + $0x1], 1 }

</bundles_post_ra>
